<compile_context>
chip_gen: v6e
topology: v6e:2x2x1
jax: 0.10.0
libtpu: 0.0.40
codegen_flags: <defaults>
</compile_context>

<pallas_src>
import functools

import jax
import jax.numpy as jnp
from jax.experimental import pallas as pl
from jax.experimental.pallas import tpu as pltpu


# ----------------------------- small helpers ------------------------------

def _round_up(x: int, m: int) -> int:
    return ((x + m - 1) // m) * m


_M_TILE_CANDIDATES = (512, 384, 256, 128, 64, 32, 16)
_N_TILE_CANDIDATES = (1024, 512, 256, 128)
_K_TILE_CANDIDATES = (2048, 1024, 512, 256, 128)


def _choose_dim_tile(dim: int, align: int, candidates):
    """Pick a tile (multiple of `align`) minimizing the padded dim size.

    Also considers the "single tile = whole (rounded) dim" option when it is
    not larger than the biggest candidate.  Tie-break: prefer the larger tile.
    """
    rounded = _round_up(dim, align)
    opts = list(candidates)
    if rounded <= max(candidates):
        opts.append(rounded)
    best_key, best_t, best_p = None, None, None
    for t in opts:
        if t % align:
            continue
        p = _round_up(dim, t)
        key = (p, -t)
        if best_key is None or key < best_key:
            best_key, best_t, best_p = key, t, p
    return best_t, best_p


def _vmem_budget():
    """(double-buffered working-set budget, vmem_limit_bytes), gen-aware."""
    try:
        cap = pltpu.get_tpu_info().vmem_capacity_bytes
    except Exception:
        cap = 64 * 1024 * 1024  # conservative (v7x-sized) fallback
    if cap >= 100 * 1024 * 1024:            # v5e / v6e: 128 MiB physical VMEM
        return 80 * 1024 * 1024, 100 * 1024 * 1024
    return 28 * 1024 * 1024, 48 * 1024 * 1024   # v7x: 64 MiB physical


def _plan(batch, in_dim, out_dim, compute_bytes, out_bytes, bias_bytes,
          force_k_grid=False):
    """Choose tiles, padded sizes and the K-collapse decision (all static)."""
    budget, vmem_limit = _vmem_budget()

    def choose_m(cap):
        return _choose_dim_tile(batch, 16,
                                [c for c in _M_TILE_CANDIDATES if c <= cap])

    def choose_n(cap):
        return _choose_dim_tile(out_dim, 128,
                                [c for c in _N_TILE_CANDIDATES if c <= cap])

    if not force_k_grid:
        # Preferred: collapse K entirely (no reduction axis, no acc RMW).
        for m_cap, n_cap in ((512, 1024), (256, 1024), (512, 512), (256, 512),
                             (256, 256), (128, 256), (128, 128)):
            tm, mp = choose_m(m_cap)
            tn, np_ = choose_n(n_cap)
            # v7x has 2 TensorCores: keep >= 2 blocks along a parallel axis.
            if mp // tm == 1 and np_ // tn == 1 and tn >= 256 and (tn // 2) % 128 == 0:
                tn //= 2
            ws = (2 * tm * in_dim * compute_bytes          # x tile, dbl-buffered
                  + 2 * in_dim * tn * compute_bytes        # w tile, dbl-buffered
                  + 2 * tm * tn * out_bytes                # out tile
                  + 2 * tn * bias_bytes)                   # bias tile
            if ws <= budget:
                return dict(collapse_k=True, tm=tm, tn=tn, tk=in_dim,
                            mp=mp, np=np_, kp=in_dim, vmem_limit=vmem_limit)

    # Fallback: K-tiled grid with an f32 VMEM accumulator (huge in_dim only).
    tm, mp = choose_m(256)
    tn, np_ = choose_n(256)

    def k_fits(tk_):
        return (2 * tm * tk_ * compute_bytes + 2 * tk_ * tn * compute_bytes
                + 2 * tm * tn * out_bytes + tm * tn * 4
                + 2 * tn * bias_bytes) <= budget

    k_cands = [c for c in _K_TILE_CANDIDATES if k_fits(c)] or [128]
    tk, kp = _choose_dim_tile(in_dim, 128, k_cands)
    return dict(collapse_k=False, tm=tm, tn=tn, tk=tk,
                mp=mp, np=np_, kp=kp, vmem_limit=vmem_limit)


# -------------------------------- kernels ---------------------------------

def _linear_bias_kernel(x_ref, w_ref, b_ref, o_ref):
    # Collapsed-K: one MXU dot per (i, j) output tile; f32 accumulate on the
    # MXU result, bias added in f32, single lane-dense store.
    acc = jnp.dot(x_ref[...], w_ref[...], preferred_element_type=jnp.float32)
    o_ref[...] = (acc + b_ref[...].astype(jnp.float32)).astype(o_ref.dtype)


def _linear_acc_kernel(x_ref, w_ref, b_ref, o_ref, acc_ref):
    # K-tiled fallback: f32 accumulator carried across the K grid axis.
    k = pl.program_id(2)

    @pl.when(k == 0)
    def _init():
        acc_ref[...] = jnp.broadcast_to(
            b_ref[...].astype(jnp.float32), acc_ref.shape)

    acc_ref[...] += jnp.dot(x_ref[...], w_ref[...],
                            preferred_element_type=jnp.float32)

    @pl.when(k == pl.num_programs(2) - 1)
    def _store():
        o_ref[...] = acc_ref[...].astype(o_ref.dtype)


# ------------------------------- forward ----------------------------------

def simple_head_forward(x, weight, bias, *, compute_dtype=jnp.bfloat16,
                        force_k_grid=False, tk_override=None):
    """SimpleHead forward: x @ weight.T + bias.

    x:      (..., in_dim)
    weight: (out_dim, in_dim)   -- PyTorch nn.Linear convention
    bias:   (out_dim,)
    returns (..., out_dim), dtype of x
    """
    orig_shape = x.shape
    in_dim = orig_shape[-1]
    out_dim, in_dim_w = weight.shape
    assert in_dim_w == in_dim and bias.shape == (out_dim,)

    x2d = x.reshape(-1, in_dim)
    batch = x2d.shape[0]

    compute_bytes = jnp.dtype(compute_dtype).itemsize
    out_dtype = x.dtype
    out_bytes = jnp.dtype(out_dtype).itemsize

    plan = _plan(batch, in_dim, out_dim, compute_bytes, out_bytes, 4,
                 force_k_grid=force_k_grid)
    if tk_override is not None and not plan["collapse_k"]:
        plan["tk"] = int(tk_override)
        plan["kp"] = _round_up(in_dim, plan["tk"])

    tm, tn, tk = plan["tm"], plan["tn"], plan["tk"]
    mp, np_, kp = plan["mp"], plan["np"], plan["kp"]
    grid_m, grid_n = mp // tm, np_ // tn

    # ---- one-time parameter prep (amortized; weight/bias are static) ----
    # Transpose to (in_dim, out_dim) so the MXU sees canonical (M,K)x(K,N)
    # (no per-step XLU transpose), cast to the MXU-native dtype, pad once.
    w_t = weight.T.astype(compute_dtype)
    if (kp, np_) != (in_dim, out_dim):
        w_t = jnp.pad(w_t, ((0, kp - in_dim), (0, np_ - out_dim)))
    b_p = bias.astype(jnp.float32)
    if np_ != out_dim:
        b_p = jnp.pad(b_p, (0, np_ - out_dim))
    b_p = b_p.reshape(1, np_)

    # ---- activation prep: bf16 cast; pad only what the grid needs ----
    # (collapsed path pads M only -- K stays at the full, un-padded array dim)
    xp = x2d.astype(compute_dtype)
    if (mp, kp) != (batch, in_dim):
        xp = jnp.pad(xp, ((0, mp - batch), (0, kp - in_dim)))

    # Honest streaming byte count: x is read grid_n times, W grid_m times.
    cost = pl.CostEstimate(
        flops=2 * mp * kp * np_,
        transcendentals=0,
        bytes_accessed=int(mp * kp * compute_bytes * grid_n
                           + kp * np_ * compute_bytes * grid_m
                           + np_ * 4 * grid_m
                           + mp * np_ * out_bytes),
    )

    if plan["collapse_k"]:
        out_p = pl.pallas_call(
            _linear_bias_kernel,
            out_shape=jax.ShapeDtypeStruct((mp, np_), out_dtype),
            grid_spec=pltpu.PrefetchScalarGridSpec(
                num_scalar_prefetch=0,
                grid=(grid_m, grid_n),
                in_specs=[
                    pl.BlockSpec((tm, kp), lambda i, j: (i, 0)),   # x tile
                    pl.BlockSpec((kp, tn), lambda i, j: (0, j)),   # W^T tile
                    pl.BlockSpec((1, tn), lambda i, j: (0, j)),    # bias tile
                ],
                out_specs=pl.BlockSpec((tm, tn), lambda i, j: (i, j)),
            ),
            compiler_params=pltpu.CompilerParams(
                dimension_semantics=("parallel", "parallel"),
                vmem_limit_bytes=plan["vmem_limit"]),
            cost_estimate=cost,
        )(xp, w_t, b_p)
    else:
        grid_k = kp // tk
        out_p = pl.pallas_call(
            _linear_acc_kernel,
            out_shape=jax.ShapeDtypeStruct((mp, np_), out_dtype),
            grid_spec=pltpu.PrefetchScalarGridSpec(
                num_scalar_prefetch=0,
                grid=(grid_m, grid_n, grid_k),
                in_specs=[
                    pl.BlockSpec((tm, tk), lambda i, j, k: (i, k)),  # x tile
                    pl.BlockSpec((tk, tn), lambda i, j, k: (k, j)),  # W^T tile
                    pl.BlockSpec((1, tn), lambda i, j, k: (0, j)),   # bias
                ],
                out_specs=pl.BlockSpec((tm, tn), lambda i, j, k: (i, j)),
                scratch_shapes=[pltpu.VMEM((tm, tn), jnp.float32)],
            ),
            compiler_params=pltpu.CompilerParams(
                dimension_semantics=("parallel", "parallel", "arbitrary"),
                vmem_limit_bytes=plan["vmem_limit"]),
            cost_estimate=cost,
        )(xp, w_t, b_p)

    out = out_p if (mp, np_) == (batch, out_dim) else out_p[:batch, :out_dim]
    return out.reshape(*orig_shape[:-1], out_dim)


# --------------------------------- demo -----------------------------------

if __name__ == "__main__":
    def make_params(key, B, in_dim, out_dim):
        kx, kw, kb = jax.random.split(key, 3)
        bound = 1.0 / float(jnp.sqrt(jnp.float32(in_dim)))
        w = jax.random.uniform(kw, (out_dim, in_dim), jnp.float32, -bound, bound)
        b = jax.random.uniform(kb, (out_dim,), jnp.float32, -bound, bound)
        x = jax.random.normal(kx, (B, in_dim), jnp.float32)
        return x, w, b

    def ref_linear(x, w, b):
        # Reference that mirrors the kernel numerics: bf16-rounded operands,
        # f32 accumulation (MXU bf16 x bf16 products are exact in f32).
        xc = x.astype(jnp.bfloat16).astype(jnp.float32)
        wc = w.astype(jnp.bfloat16).astype(jnp.float32)
        return (xc @ wc.T + b.astype(jnp.float32)).astype(x.dtype)

    ok = True

    # Test 1: tiny shapes from the module demo (collapsed-K, single tile).
    fwd = jax.jit(simple_head_forward)
    x1, w1, b1 = make_params(jax.random.PRNGKey(0), 8, 32, 16)
    out1 = jax.block_until_ready(fwd(x1, w1, b1))
    ok &= out1.shape == (8, 16)
    ok &= bool(jnp.allclose(out1, ref_linear(x1, w1, b1), atol=2e-3, rtol=2e-3))

    # Test 2: awkward shapes (M/N padding, 2 N tiles for megacore), collapsed-K.
    x2, w2, b2 = make_params(jax.random.PRNGKey(1), 300, 640, 200)
    out2 = jax.block_until_ready(fwd(x2, w2, b2))
    ok &= out2.shape == (300, 200)
    ok &= bool(jnp.allclose(out2, ref_linear(x2, w2, b2), atol=2e-3, rtol=2e-3))

    # Test 3: force the K-tiled accumulator fallback (3 K steps) to verify it.
    fwd_k = jax.jit(functools.partial(simple_head_forward,
                                      force_k_grid=True, tk_override=128))
    x3, w3, b3 = make_params(jax.random.PRNGKey(2), 64, 384, 256)
    out3 = jax.block_until_ready(fwd_k(x3, w3, b3))
    ok &= out3.shape == (64, 256)
    ok &= bool(jnp.allclose(out3, ref_linear(x3, w3, b3), atol=2e-3, rtol=2e-3))

    if ok:
        print("KERNEL_OK")
    else:
        raise SystemExit("numerical mismatch")
</pallas_src>

<mosaic_0001>
module attributes {stable_mosaic.version = 11 : i64} {
  func.func @_linear_bias_kernel(%arg0: i32, %arg1: i32, %arg2: memref<16x32xbf16, #tpu.memory_space<vmem>>, %arg3: memref<32x128xbf16, #tpu.memory_space<vmem>>, %arg4: memref<1x128xf32, #tpu.memory_space<vmem>>, %arg5: memref<16x128xf32, #tpu.memory_space<vmem>>) attributes {dimension_semantics = [#tpu.dimension_semantics<parallel>, #tpu.dimension_semantics<parallel>], iteration_bounds = array<i64: 1, 1>, scalar_prefetch = 0 : i64, scratch_operands = 0 : i64, tpu.core_type = #tpu.core_type<tc>, window_params = [{transform_indices = @transform_0, window_bounds = array<i64: 16, 32>}, {transform_indices = @transform_1, window_bounds = array<i64: 32, 128>}, {transform_indices = @transform_2, window_bounds = array<i64: 1, 128>}, {transform_indices = @transform_3, window_bounds = array<i64: 16, 128>}]} {
    %c0 = arith.constant 0 : index
    %c0_0 = arith.constant 0 : index
    %0 = vector.load %arg2[%c0, %c0_0] : memref<16x32xbf16, #tpu.memory_space<vmem>>, vector<16x32xbf16>
    %c0_1 = arith.constant 0 : index
    %c0_2 = arith.constant 0 : index
    %1 = vector.load %arg3[%c0_1, %c0_2] : memref<32x128xbf16, #tpu.memory_space<vmem>>, vector<32x128xbf16>
    %cst = arith.constant dense<0.000000e+00> : vector<16x128xf32>
    %2 = tpu.matmul %0, %1, %cst {dimension_numbers = #tpu.dot_dimension_numbers<[1], [0], [0], [1], [0, 0, 1, 1], [], []>} : vector<16x32xbf16>, vector<32x128xbf16>, vector<16x128xf32> -> vector<16x128xf32>
    %c0_3 = arith.constant 0 : index
    %c0_4 = arith.constant 0 : index
    %3 = vector.load %arg4[%c0_3, %c0_4] : memref<1x128xf32, #tpu.memory_space<vmem>>, vector<1x128xf32>
    %4 = vector.broadcast %3 : vector<1x128xf32> to vector<16x128xf32>
    %5 = arith.addf %2, %4 : vector<16x128xf32>
    %c0_5 = arith.constant 0 : index
    %c0_6 = arith.constant 0 : index
    %6 = vector.load %arg5[%c0_5, %c0_6] : memref<16x128xf32, #tpu.memory_space<vmem>>, vector<16x128xf32>
    tpu.vector_store %arg5[%c0_5, %c0_6], %5 {strides = array<i32>} : memref<16x128xf32, #tpu.memory_space<vmem>>, vector<16x128xf32>,
    return
  }
  func.func @transform_0(%arg0: i32, %arg1: i32) -> (i32, i32) {
    %c0_i32 = arith.constant 0 : i32
    %c0_i32_0 = arith.constant 0 : i32
    return %arg0, %c0_i32 : i32, i32
  }
  func.func @transform_1(%arg0: i32, %arg1: i32) -> (i32, i32) {
    %c0_i32 = arith.constant 0 : i32
    %c0_i32_0 = arith.constant 0 : i32
    return %c0_i32, %arg1 : i32, i32
  }
  func.func @transform_2(%arg0: i32, %arg1: i32) -> (i32, i32) {
    %c0_i32 = arith.constant 0 : i32
    %c0_i32_0 = arith.constant 0 : i32
    return %c0_i32, %arg1 : i32, i32
  }
  func.func @transform_3(%arg0: i32, %arg1: i32) -> (i32, i32) {
    %c0_i32 = arith.constant 0 : i32
    return %arg0, %arg1 : i32, i32
  }
}

</mosaic_0001>

<bundles_post_ra>
// kernel: simple_head_forward.1
= control target key start
LH: loop header
LB: loop body
LE: loop exit
PB: predicated region body
PF: predicated region fallthrough
CT: control target
= control target key end

     0   :  { %v117_v0 = vmov 0.0   ;;  %vm118_vm0 = vmmov 0   ;;  %vm45_vm1 = vcmask 261120   ;;  %s157_s1 = inlined_call_operand.vmem [shape: bf16[32,128], index: 1, kind: input, shape index: {}]   ;;  %s158_s0 = inlined_call_operand.vmem [shape: bf16[16,32], index: 0, kind: input, shape index: {}]   ;;  %s159_s2 = inlined_call_operand.vmem [shape: f32[1,128], index: 2, kind: input, shape index: {}]   ;;  %s160_s3 = inlined_call_operand.vmem [shape: f32[16,128], index: 3, kind: output, shape index: {}]  }
   0x1   :  { %104 = vmatprep.subr.bf16.mxu0 %v117_v0  ;;  %v114_v1 = vld [vmem:[%s157_s1 + $0x8] sm:$0xff]   ;;  %108 = vmatprep.mubr.msk.bf16.mxu0 %vm118_vm0, %v117_v0  ;;  %v115_v2 = vld [vmem:[%s157_s1] sm:$0xff]  }
   0x2   :  { %105 = vmatpush3.bf16.msra.mxu0 %v114_v1  ;;  %v116_v3 = vld [vmem:[%s158_s0] sm:$0xff]  }
   0x3   :  { %106 = vmatprep.subr.bf16.mxu0 %v117_v0  ;;  %v96_v4 = vld [vmem:[%s159_s2] ss:$0 sm:$0xff] }
   0x6   :  { %107 = vmatpush3.bf16.msra.mxu0 %v115_v2 }
   0x9   :  { %109 = vmatmul.mubr.msk.bf16.vlgmr.msra.gmra.mxu0 %vm45_vm1, %v116_v3 }
  0xc9   :  { %v83_v5 = vpop.f32.mrf.mxu0 }
  0xca   :  { %v84_v6 = vadd.f32 %v96_v4, %v83_v5 }
  0xcb   :  { %v110_v7 = vpop.f32.mrf.mxu0 }
  0xcc   :  { %90 = vst [vmem:[%s160_s3] sm:$0xff] %v84_v6 }
  0xcd   :  { %v86_v8 = vpop.f32.mrf.mxu0 }
  0xce   :  { %v87_v9 = vadd.f32 %v96_v4, %v86_v8 }
  0xcf   :  { %v111_v10 = vpop.f32.mrf.mxu0 }
  0xd0   :  { %91 = vst [vmem:[%s160_s3 + $0x8] sm:$0xff] %v87_v9 }

</bundles_post_ra>
